<compile_context>
chip_gen: v6e
topology: v6e:2x2x1
jax: 0.10.0
libtpu: 0.0.40
codegen_flags: <defaults>
</compile_context>

<pallas_src>
import math
import functools

import jax
import jax.numpy as jnp
from jax import lax
from jax.experimental import pallas as pl
from jax.experimental.pallas import tpu as pltpu


def make_positional_encoding(d_model: int, max_len: int = 5000) -> jnp.ndarray:
    """PE table identical to the PyTorch __init__; shape [max_len, 1, d_model]."""
    position = jnp.arange(max_len, dtype=jnp.float32)[:, None]              # [L, 1]
    div_term = jnp.exp(
        jnp.arange(0, d_model, 2, dtype=jnp.float32)
        * (-math.log(10000.0) / d_model)
    )                                                                        # [D/2]
    pe = jnp.zeros((max_len, d_model), dtype=jnp.float32)
    pe = pe.at[:, 0::2].set(jnp.sin(position * div_term))
    pe = pe.at[:, 1::2].set(jnp.cos(position * div_term))
    return pe[:, None, :]                                                    # [L, 1, D]


def _fmix32(h):
    """murmur3 finalizer: good bit mixing of a uint32 counter (pure VPU ops)."""
    h = h ^ (h >> 16)
    h = h * jnp.uint32(0x85EBCA6B)
    h = h ^ (h >> 13)
    h = h * jnp.uint32(0xC2B2AE35)
    h = h ^ (h >> 16)
    return h


def _pe_kernel(seed_ref, x_ref, pe_ref, o_ref, *, p: float, training: bool,
               tile_s: int, batch: int, d_model: int):
    """seed_ref: SMEM (1,) int32; x_ref: (TS,B,D); pe_ref: (TS,1,D); o_ref: (TS,B,D)."""
    y = x_ref[...] + pe_ref[...]                       # broadcast add over batch axis

    if training and p > 0.0:
        if p >= 1.0:
            y = jnp.zeros_like(y)
        else:
            # Counter-based dropout mask: hash(global element index, seed).
            shape = y.shape                             # (TS, B, D)
            s_idx = lax.broadcasted_iota(jnp.uint32, shape, 0)
            s_idx = s_idx + (pl.program_id(0) * tile_s).astype(jnp.uint32)
            b_idx = lax.broadcasted_iota(jnp.uint32, shape, 1)
            d_idx = lax.broadcasted_iota(jnp.uint32, shape, 2)
            idx = (s_idx * jnp.uint32(batch) + b_idx) * jnp.uint32(d_model) + d_idx

            seed = seed_ref[0].astype(jnp.uint32) * jnp.uint32(0x9E3779B9)
            bits = _fmix32(_fmix32(idx ^ seed))

            # keep with probability (1 - p); clamp threshold inside uint32 range.
            threshold = jnp.uint32(min(int(round(p * float(2**32))), 2**32 - 1))
            keep = bits >= threshold
            scale = jnp.asarray(1.0 / (1.0 - p), dtype=y.dtype)
            y = jnp.where(keep, y * scale, jnp.zeros_like(y))

    o_ref[...] = y.astype(o_ref.dtype)


def _pick_tile(seq_len: int, bytes_per_row: int, target_bytes: int = 2 << 20) -> int:
    """Largest tile (rows of x) <= ~target_bytes that evenly divides seq_len."""
    t = max(1, min(seq_len, target_bytes // max(1, bytes_per_row)))
    while seq_len % t != 0:
        t -= 1
    return t


@functools.partial(jax.jit, static_argnames=("p", "training", "tile_s"))
def positional_encoding_forward(x, pe, seed, *, p: float = 0.1,
                                training: bool = False, tile_s=None):
    """x: [S, B, D]; pe: [max_len, 1, D]; seed: int32 scalar (used iff training)."""
    S, B, D = x.shape
    max_len = pe.shape[0]
    assert pe.shape == (max_len, 1, D) and max_len >= S

    pe = pe.astype(x.dtype)                             # cast once, not per tile
    seed_arr = jnp.reshape(jnp.asarray(seed, dtype=jnp.int32), (1,))

    if tile_s is None:
        tile_s = _pick_tile(S, B * D * x.dtype.itemsize)
    assert S % tile_s == 0

    kernel = functools.partial(_pe_kernel, p=p, training=training,
                               tile_s=tile_s, batch=B, d_model=D)

    return pl.pallas_call(
        kernel,
        out_shape=jax.ShapeDtypeStruct((S, B, D), x.dtype),
        grid=(pl.cdiv(S, tile_s),),
        in_specs=[
            pl.BlockSpec(memory_space=pltpu.MemorySpace.SMEM),          # seed (1,)
            pl.BlockSpec((tile_s, B, D), lambda i: (i, 0, 0)),          # x tile
            pl.BlockSpec((tile_s, 1, D), lambda i: (i, 0, 0)),          # pe rows
        ],
        out_specs=pl.BlockSpec((tile_s, B, D), lambda i: (i, 0, 0)),
        compiler_params=pltpu.CompilerParams(
            dimension_semantics=("parallel",)),
    )(seed_arr, x, pe)


if __name__ == "__main__":
    # Small shapes consistent with the module: [seq_len, batch, d_model].
    seq_len, batch, d_model = 8, 2, 32
    max_len = 64  # small synthetic table (module default is 5000)

    key = jax.random.PRNGKey(0)
    x = jax.random.normal(key, (seq_len, batch, d_model), dtype=jnp.float32)
    pe = make_positional_encoding(d_model, max_len)     # [max_len, 1, d_model]

    # Eval-mode forward (dropout is identity), matching module.eval() semantics.
    out = positional_encoding_forward(x, pe, 0, p=0.1, training=False)
    out = jax.block_until_ready(out)
    ref = x + pe[:seq_len]
    assert out.shape == (seq_len, batch, d_model)
    assert jnp.allclose(out, ref, atol=1e-6), "mismatch vs reference (eval)"

    # Exercise a real multi-tile grid (4 sequence tiles) and check numerics.
    S2, B2, D2 = 64, 8, 128
    x2 = jax.random.normal(jax.random.PRNGKey(1), (S2, B2, D2), dtype=jnp.float32)
    pe2 = make_positional_encoding(D2, 128)
    out2 = positional_encoding_forward(x2, pe2, 0, p=0.1, training=False, tile_s=16)
    out2 = jax.block_until_ready(out2)
    assert jnp.allclose(out2, x2 + pe2[:S2], atol=1e-6), "mismatch vs reference (tiled)"

    # Training path: inverted dropout inside the kernel.  Every surviving
    # element must equal (x + pe) / (1 - p); dropped elements are exactly 0.
    p_drop = 0.1
    out_t = positional_encoding_forward(x, pe, 42, p=p_drop, training=True)
    out_t = jax.block_until_ready(out_t)
    scaled = ref / (1.0 - p_drop)
    kept = out_t != 0
    assert jnp.allclose(jnp.where(kept, out_t, 0.0),
                        jnp.where(kept, scaled, 0.0), atol=1e-5), "dropout scale mismatch"

    print("KERNEL_OK")
</pallas_src>

<mosaic_0001>
module attributes {stable_mosaic.version = 11 : i64} {
  func.func @_pe_kernel(%arg0: i32, %arg1: memref<1xi32, #tpu.memory_space<smem>>, %arg2: memref<8x2x32xf32, #tpu.memory_space<vmem>>, %arg3: memref<8x1x32xf32, #tpu.memory_space<vmem>>, %arg4: memref<8x2x32xf32, #tpu.memory_space<vmem>>) attributes {dimension_semantics = [#tpu.dimension_semantics<parallel>], iteration_bounds = array<i64: 1>, scalar_prefetch = 0 : i64, scratch_operands = 0 : i64, tpu.core_type = #tpu.core_type<tc>, window_params = [{transform_indices = @transform_0, window_bounds = array<i64: 1>}, {transform_indices = @transform_1, window_bounds = array<i64: 8, 2, 32>}, {transform_indices = @transform_2, window_bounds = array<i64: 8, 1, 32>}, {transform_indices = @transform_3, window_bounds = array<i64: 8, 2, 32>}]} {
    %c0 = arith.constant 0 : index
    %c0_0 = arith.constant 0 : index
    %c0_1 = arith.constant 0 : index
    %0 = vector.load %arg2[%c0, %c0_0, %c0_1] : memref<8x2x32xf32, #tpu.memory_space<vmem>>, vector<8x2x32xf32>
    %c0_2 = arith.constant 0 : index
    %c0_3 = arith.constant 0 : index
    %c0_4 = arith.constant 0 : index
    %1 = vector.load %arg3[%c0_2, %c0_3, %c0_4] : memref<8x1x32xf32, #tpu.memory_space<vmem>>, vector<8x1x32xf32>
    %2 = vector.broadcast %1 : vector<8x1x32xf32> to vector<8x2x32xf32>
    %3 = arith.addf %0, %2 : vector<8x2x32xf32>
    %c0_5 = arith.constant 0 : index
    %c0_6 = arith.constant 0 : index
    %c0_7 = arith.constant 0 : index
    %4 = vector.load %arg4[%c0_5, %c0_6, %c0_7] : memref<8x2x32xf32, #tpu.memory_space<vmem>>, vector<8x2x32xf32>
    tpu.vector_store %arg4[%c0_5, %c0_6, %c0_7], %3 {strides = array<i32>} : memref<8x2x32xf32, #tpu.memory_space<vmem>>, vector<8x2x32xf32>,
    return
  }
  func.func @transform_0(%arg0: i32) -> i32 {
    %c0_i32 = arith.constant 0 : i32
    %c0_i32_0 = arith.constant 0 : i32
    return %c0_i32 : i32
  }
  func.func @transform_1(%arg0: i32) -> (i32, i32, i32) {
    %c0_i32 = arith.constant 0 : i32
    %c0_i32_0 = arith.constant 0 : i32
    %c0_i32_1 = arith.constant 0 : i32
    return %arg0, %c0_i32, %c0_i32_0 : i32, i32, i32
  }
  func.func @transform_2(%arg0: i32) -> (i32, i32, i32) {
    %c0_i32 = arith.constant 0 : i32
    %c0_i32_0 = arith.constant 0 : i32
    %c0_i32_1 = arith.constant 0 : i32
    return %arg0, %c0_i32, %c0_i32_0 : i32, i32, i32
  }
  func.func @transform_3(%arg0: i32) -> (i32, i32, i32) {
    %c0_i32 = arith.constant 0 : i32
    %c0_i32_0 = arith.constant 0 : i32
    %c0_i32_1 = arith.constant 0 : i32
    return %arg0, %c0_i32, %c0_i32_0 : i32, i32, i32
  }
}

</mosaic_0001>

<bundles_post_ra>
// kernel: positional_encoding_forward.1
= control target key start
LH: loop header
LB: loop body
LE: loop exit
PB: predicated region body
PF: predicated region fallthrough
CT: control target
= control target key end

     0   :  { %vm88_vm0 = vcmask 254976   ;;  %s228_s0 = inlined_call_operand.<no memory space> [shape: s32[1], index: 0, kind: input, shape index: {}]   ;;  %s229_s1 = inlined_call_operand.vmem [shape: f32[8,2,32], index: 1, kind: input, shape index: {}]   ;;  %s230_s2 = inlined_call_operand.vmem [shape: f32[64,1,32], index: 2, kind: input, shape index: {}]   ;;  %s231_s3 = inlined_call_operand.hbm [shape: f32[8,2,32], index: 3, kind: output, shape index: {}]  }
   0x1   :  { %v16_v0 = vld [vmem:[%s229_s1] sm:$0x3]  ;;  %v17_v3 = vld [vmem:[%s229_s1 + $0x2] sm:$0x3]  ;;  %v18_v5 = vld [vmem:[%s229_s1 + $0x4] sm:$0x3] }
   0x2   :  { %v113_v1 = vld [vmem:[%s230_s2] ss:$0 sm:$0xff]  ;;  %v114_v4 = vld [vmem:[%s230_s2 + $0x1] ss:$0 sm:$0xff]  ;;  %v115_v7 = vld [vmem:[%s230_s2 + $0x2] ss:$0 sm:$0xff] }
   0x3   :  { %v80_v2 = vadd.f32 %v113_v1, %v16_v0  ;;  %v81_v6 = vadd.f32 %v114_v4, %v17_v3  ;;  %v19_v8 = vld [vmem:[%s229_s1 + $0x6] sm:$0x3]  ;;  %v116_v9 = vld [vmem:[%s230_s2 + $0x3] ss:$0 sm:$0xff]  ;;  %v82_v10 = vadd.f32 %v115_v7, %v18_v5  ;;  %v20_v12 = vld [vmem:[%s229_s1 + $0x8] sm:$0x3] }
   0x4   :  { %v83_v11 = vadd.f32 %v116_v9, %v19_v8  ;;  %v117_v13 = vld [vmem:[%s230_s2 + $0x4] ss:$0 sm:$0xff]  ;;  %v21_v14 = vld [vmem:[%s229_s1 + $0xa] sm:$0x3]  ;;  %v118_v16 = vld [vmem:[%s230_s2 + $0x5] ss:$0 sm:$0xff] }
   0x5   :  { %89 = vst.msk [vmem:[#allocation3] sm:$0x3] %vm88_vm0, %v80_v2  ;;  %90 = vst.msk [vmem:[#allocation3 + $0x2] sm:$0x3] %vm88_vm0, %v81_v6  ;;  %v84_v15 = vadd.f32 %v117_v13, %v20_v12  ;;  %v22_v17 = vld [vmem:[%s229_s1 + $0xc] sm:$0x3]  ;;  %v85_v19 = vadd.f32 %v118_v16, %v21_v14 }
   0x6   :  { %v119_v18 = vld [vmem:[%s230_s2 + $0x6] ss:$0 sm:$0xff]  ;;  %91 = vst.msk [vmem:[#allocation3 + $0x4] sm:$0x3] %vm88_vm0, %v82_v10  ;;  %92 = vst.msk [vmem:[#allocation3 + $0x6] sm:$0x3] %vm88_vm0, %v83_v11 }
   0x7   :  { %v86_v20 = vadd.f32 %v119_v18, %v22_v17  ;;  %v23_v21 = vld [vmem:[%s229_s1 + $0xe] sm:$0x3]  ;;  %v120_v22 = vld [vmem:[%s230_s2 + $0x7] ss:$0 sm:$0xff] }
   0x8   :  { %9 = vsyncpa [#allocation4], 0  ;;  %93 = vst.msk [vmem:[#allocation3 + $0x8] sm:$0x3] %vm88_vm0, %v84_v15  ;;  %v87_v23 = vadd.f32 %v120_v22, %v23_v21  ;;  %s146_s0 = smov [#allocation3]  }
   0x9   :  { %s102_s16 = sshll.u32 %s146_s0, 4  ;;  %94 = vst.msk [vmem:[#allocation3 + $0xa] sm:$0x3] %vm88_vm0, %v85_v19  ;;  %95 = vst.msk [vmem:[#allocation3 + $0xc] sm:$0x3] %vm88_vm0, %v86_v20  ;;  %s103_s16 = int_to_ptr.vmem [resolvable:$true] %s102_s16 }
   0xa   :  { %96 = vst.msk [vmem:[#allocation3 + $0xe] sm:$0x3] %vm88_vm0, %v87_v23  ;;  %s124_s17 = scalar_lea.vmem %s103_s16, 256  ;;  %p129_p1 = scmp.lt.s32.totalorder %s103_s16, %s103_s16 }
   0xb   :  { %p125_p0 = scmp.ne.s32.totalorder %s103_s16, %s124_s17  ;;  %p130_p2 = scmp.lt.s32.totalorder %s124_s17, %s124_s17 }
   0xd   :  { %p131_p3 = por %p130_p2, %p129_p1 }
   0xf   :  { %p132_p4 = pnand %p131_p3, %p125_p0 }
  0x11   :  { %135 = shalt.err (!%p132_p4)
}
  0x12   :  { %s147_s1 = smov 32   ;;  %s148_s2 = smov 2  }
  0x13   :  { %108 = dma.vmem_to_hbm [thread:$0]  %s103_s16, 256, %s231_s3, [#allocation4], %s147_s1, %s147_s1, %s148_s2  }
  0x14   :  { %144 = dma.done.wait [#allocation4], 256  }
  0x15   :  { %145 = vsyncadd [#allocation4], 4294967040 }
  0x16   :  { %112 = vsyncpa [#allocation4], 1 }

</bundles_post_ra>
